<compile_context>
chip_gen: v7x
topology: tpu7x:2x2x1
jax: 0.10.0
libtpu: 0.0.40
codegen_flags: <defaults>
</compile_context>

<pallas_src>
import functools

import jax
import jax.numpy as jnp
from jax.experimental import pallas as pl
from jax.experimental.pallas import tpu as pltpu

_LANES = 128
_SMEM = pltpu.MemorySpace.SMEM


def _exponent(x, a, b):
    # e = a*|x - x^3| + b*|x + x^3|   with  x^3 == sign(x)*|x|^3
    x3 = x * x * x
    return a * jnp.abs(x - x3) + b * jnp.abs(x + x3)


def _valid_mask(shape, row0, total):
    # Flat-index mask for ragged tails; `total` is baked in at trace time.
    rows = jax.lax.broadcasted_iota(jnp.int32, shape, 0) + row0
    cols = jax.lax.broadcasted_iota(jnp.int32, shape, 1)
    return rows * shape[1] + cols < total


def _min_all(v):   # (R, C) -> (1, 1), rank-2 throughout
    return jnp.min(jnp.min(v, axis=1, keepdims=True), axis=0, keepdims=True)


def _max_all(v):   # (R, C) -> (1, 1)
    return jnp.max(jnp.max(v, axis=1, keepdims=True), axis=0, keepdims=True)


# ----------------------------------------------------------------------------- pass 1
def _reduce_kernel(params_ref, x_ref, min_out, max_out, *, total, needs_mask):
    # params_ref: SMEM (3,) f32 = [a, b, scale]
    # x_ref:      VMEM (tm, 128) block of x (native dtype)
    # min_out/max_out: (8, 128) f32 resident accumulator outputs (constant index_map)
    a = params_ref[0]
    b = params_ref[1]
    x = x_ref[...].astype(jnp.float32)
    e = _exponent(x, a, b)
    tm, lanes = x.shape

    if needs_mask:
        valid = _valid_mask((tm, lanes), pl.program_id(0) * tm, total)
        e_lo = jnp.where(valid, e, jnp.inf)
        e_hi = jnp.where(valid, e, -jnp.inf)
    else:
        e_lo, e_hi = e, e

    if tm % 8 == 0:
        # Pure-VPU fold of the block into one vreg-sized partial (no per-step XLU reduce).
        tile_min = jnp.min(e_lo.reshape(tm // 8, 8, lanes), axis=0)
        tile_max = jnp.max(e_hi.reshape(tm // 8, 8, lanes), axis=0)
    else:
        # Only reachable when tm == full row count (single grid step).
        tile_min = jnp.broadcast_to(jnp.min(e_lo, axis=0, keepdims=True), (8, lanes))
        tile_max = jnp.broadcast_to(jnp.max(e_hi, axis=0, keepdims=True), (8, lanes))

    @pl.when(pl.program_id(0) == 0)
    def _():
        min_out[...] = tile_min
        max_out[...] = tile_max

    @pl.when(pl.program_id(0) > 0)
    def _():
        min_out[...] = jnp.minimum(min_out[...], tile_min)
        max_out[...] = jnp.maximum(max_out[...], tile_max)


# ----------------------------------------------------------------------------- pass 2
def _apply_kernel(params_ref, min_ref, max_ref, x_ref, o_ref):
    # params_ref: SMEM (3,) f32 = [a, b, scale]
    # min_ref/max_ref: (8, 128) f32 exponent partials from pass 1 (resident blocks)
    a = params_ref[0]
    b = params_ref[1]
    scale = params_ref[2]
    e_min = _min_all(min_ref[...])          # (1, 1)
    e_max = _max_all(max_ref[...])          # (1, 1)

    x = x_ref[...].astype(jnp.float32)
    e = _exponent(x, a, b)
    # Overflow-safe shifted normalisation (== reference in exact arithmetic):
    #   scale*(exp(e)-exp(e_min))/(exp(e_max)-exp(e_min))
    #     = scale*(exp(e-e_max)-exp(e_min-e_max))/(1-exp(e_min-e_max))
    d = jnp.exp(e_min - e_max)              # (1, 1)
    cnorm = scale / (1.0 - d)               # (1, 1); div-by-zero for constant x == reference behaviour
    w = (jnp.exp(e - e_max) - d) * cnorm
    o_ref[...] = (w * jnp.tanh(x)).astype(o_ref.dtype)


# ------------------------------------------------------------------- fused single pass
def _fused_kernel(params_ref, x_ref, o_ref, *, total, needs_mask):
    a = params_ref[0]
    b = params_ref[1]
    scale = params_ref[2]
    x = x_ref[...].astype(jnp.float32)
    e = _exponent(x, a, b)

    if needs_mask:
        valid = _valid_mask(e.shape, 0, total)
        e_lo = jnp.where(valid, e, jnp.inf)
        e_hi = jnp.where(valid, e, -jnp.inf)
    else:
        e_lo, e_hi = e, e

    e_min = _min_all(e_lo)                  # (1, 1)
    e_max = _max_all(e_hi)                  # (1, 1)
    d = jnp.exp(e_min - e_max)
    cnorm = scale / (1.0 - d)
    w = (jnp.exp(e - e_max) - d) * cnorm
    o_ref[...] = (w * jnp.tanh(x)).astype(o_ref.dtype)


# ------------------------------------------------------------------------------ driver
def custom_sensitive_tanh(x, a, b, scale, *, block_rows=4096, fused_max_elems=256 * 1024):
    """CustomSensitiveTanh forward (global min/max normalisation). Any shape; f32 math."""
    orig_shape = x.shape
    orig_dtype = x.dtype
    total = x.size
    if total == 0:
        return x

    # bf16 stays bf16 over HBM (halves traffic); everything else goes through f32 I/O.
    if orig_dtype == jnp.bfloat16 or orig_dtype == jnp.float32:
        io_dtype = orig_dtype
    else:
        io_dtype = jnp.float32
    itemsize = 2 if io_dtype == jnp.bfloat16 else 4

    params = jnp.stack([
        jnp.asarray(a, dtype=jnp.float32).reshape(()),
        jnp.asarray(b, dtype=jnp.float32).reshape(()),
        jnp.asarray(scale, dtype=jnp.float32).reshape(()),
    ])

    xf = x.reshape(-1)
    if xf.dtype != io_dtype:
        xf = xf.astype(io_dtype)

    rows = pl.cdiv(total, _LANES)
    padded = rows * _LANES != total
    if padded:
        # TODO(synk): only the sub-128 remainder pads; pad value is irrelevant (masked).
        xf = jnp.pad(xf, (0, rows * _LANES - total))
    x2 = xf.reshape(rows, _LANES)

    if total <= fused_max_elems:
        # Whole slab fits in VMEM: one read + one write, one launch.
        out2 = pl.pallas_call(
            functools.partial(_fused_kernel, total=total, needs_mask=padded),
            out_shape=jax.ShapeDtypeStruct((rows, _LANES), io_dtype),
            grid=(1,),
            in_specs=[
                pl.BlockSpec(memory_space=_SMEM),
                pl.BlockSpec((rows, _LANES), lambda i: (0, 0)),
            ],
            out_specs=pl.BlockSpec((rows, _LANES), lambda i: (0, 0)),
            cost_estimate=pl.CostEstimate(
                flops=22 * total, transcendentals=2 * total,
                bytes_accessed=2 * total * itemsize),
        )(params, x2)
    else:
        tm = block_rows if rows >= block_rows else rows
        grid = (pl.cdiv(rows, tm),)
        needs_mask = padded or (rows % tm != 0)

        # Pass 1: running (8,128) min/max of the exponent, resident across the grid.
        e_min_p, e_max_p = pl.pallas_call(
            functools.partial(_reduce_kernel, total=total, needs_mask=needs_mask),
            out_shape=(jax.ShapeDtypeStruct((8, _LANES), jnp.float32),
                       jax.ShapeDtypeStruct((8, _LANES), jnp.float32)),
            grid=grid,
            in_specs=[
                pl.BlockSpec(memory_space=_SMEM),
                pl.BlockSpec((tm, _LANES), lambda i: (i, 0)),
            ],
            out_specs=(pl.BlockSpec((8, _LANES), lambda i: (0, 0)),
                       pl.BlockSpec((8, _LANES), lambda i: (0, 0))),
            compiler_params=pltpu.CompilerParams(
                dimension_semantics=("arbitrary",)),
            cost_estimate=pl.CostEstimate(
                flops=10 * total, transcendentals=0,
                bytes_accessed=total * itemsize),
        )(params, x2)

        # Pass 2: purely elementwise; normalisation constants derived in-kernel from the
        # partials (no tiny inter-pass XLA ops).  Megacore-shardable.
        out2 = pl.pallas_call(
            _apply_kernel,
            out_shape=jax.ShapeDtypeStruct((rows, _LANES), io_dtype),
            grid=grid,
            in_specs=[
                pl.BlockSpec(memory_space=_SMEM),
                pl.BlockSpec((8, _LANES), lambda i: (0, 0)),
                pl.BlockSpec((8, _LANES), lambda i: (0, 0)),
                pl.BlockSpec((tm, _LANES), lambda i: (i, 0)),
            ],
            out_specs=pl.BlockSpec((tm, _LANES), lambda i: (i, 0)),
            compiler_params=pltpu.CompilerParams(
                dimension_semantics=("parallel",)),
            cost_estimate=pl.CostEstimate(
                flops=14 * total, transcendentals=2 * total,
                bytes_accessed=2 * total * itemsize),
        )(params, e_min_p, e_max_p, x2)

    out_flat = out2.reshape(-1)
    if padded:
        out_flat = out_flat[:total]
    out = out_flat.reshape(orig_shape)
    if out.dtype != orig_dtype:
        out = out.astype(orig_dtype)
    return out


def _reference(x, a, b, scale):
    xf = x.astype(jnp.float32)
    cubic = jnp.sign(xf) * jnp.abs(xf) ** 3
    raw = jnp.exp(a * jnp.abs(xf - cubic) + b * jnp.abs(xf + cubic))
    w = scale * ((raw - raw.min()) / (raw.max() - raw.min()))
    return w * jnp.tanh(xf)


if __name__ == "__main__":
    a, b, scale = 0.05, 0.10, 1.0
    key = jax.random.PRNGKey(0)
    k1, k2, k3, k4 = jax.random.split(key, 4)

    # 1) Primary, module-consistent NCHW shape -> fused single-pass path.
    x = jax.random.normal(key, (2, 4, 16, 16), dtype=jnp.float32)
    out = jax.block_until_ready(custom_sensitive_tanh(x, a, b, scale))
    ref = _reference(x, a, b, scale)
    assert out.shape == x.shape and out.dtype == x.dtype
    assert jnp.allclose(out, ref, rtol=1e-4, atol=2e-5), "fused path mismatch"

    # 2) Larger input -> two-pass path with a multi-step accumulator grid.
    x_big = jax.random.normal(k1, (16, 16, 64, 64), dtype=jnp.float32)
    out_big = jax.block_until_ready(custom_sensitive_tanh(x_big, a, b, scale))
    assert jnp.allclose(out_big, _reference(x_big, a, b, scale),
                        rtol=1e-4, atol=2e-5), "two-pass path mismatch"

    # 3) Ragged element count (not a multiple of 128) -> in-kernel masking, fused path.
    x_rag = jax.random.normal(k2, (3, 5, 7, 11), dtype=jnp.float32)
    out_rag = jax.block_until_ready(custom_sensitive_tanh(x_rag, a, b, scale))
    assert jnp.allclose(out_rag, _reference(x_rag, a, b, scale),
                        rtol=1e-4, atol=2e-5), "ragged fused path mismatch"

    # 4) Ragged + large enough for the two-pass path (exercises the reduce-pass mask).
    x_rag2 = jax.random.normal(k3, (2, 4, 182, 181), dtype=jnp.float32)
    out_rag2 = jax.block_until_ready(custom_sensitive_tanh(x_rag2, a, b, scale))
    assert jnp.allclose(out_rag2, _reference(x_rag2, a, b, scale),
                        rtol=1e-4, atol=2e-5), "ragged two-pass path mismatch"

    # 5) bf16 HBM I/O (compute in f32, emit bf16).
    x_bf = jax.random.normal(k4, (2, 4, 16, 16), dtype=jnp.bfloat16)
    out_bf = jax.block_until_ready(custom_sensitive_tanh(x_bf, a, b, scale))
    assert out_bf.dtype == jnp.bfloat16
    assert jnp.allclose(out_bf.astype(jnp.float32),
                        _reference(x_bf, a, b, scale),
                        rtol=2e-2, atol=2e-2), "bf16 path mismatch"

    print("KERNEL_OK")
</pallas_src>

<mosaic_0001>
module attributes {stable_mosaic.version = 11 : i64} {
  func.func @_fused_kernel(%arg0: i32, %arg1: memref<3xf32, #tpu.memory_space<smem>>, %arg2: memref<16x128xf32, #tpu.memory_space<vmem>>, %arg3: memref<16x128xf32, #tpu.memory_space<vmem>>) attributes {dimension_semantics = [#tpu.dimension_semantics<arbitrary>], iteration_bounds = array<i64: 1>, scalar_prefetch = 0 : i64, scratch_operands = 0 : i64, tpu.core_type = #tpu.core_type<tc>, window_params = [{transform_indices = @transform_0, window_bounds = array<i64: 3>}, {pipeline_mode = #tpu.pipeline_mode<synchronous>, transform_indices = @transform_1, window_bounds = array<i64: 16, 128>}, {pipeline_mode = #tpu.pipeline_mode<synchronous>, transform_indices = @transform_2, window_bounds = array<i64: 16, 128>}]} {
    %c0 = arith.constant 0 : index
    %0 = memref.load %arg1[%c0] : memref<3xf32, #tpu.memory_space<smem>>
    %c1 = arith.constant 1 : index
    %1 = memref.load %arg1[%c1] : memref<3xf32, #tpu.memory_space<smem>>
    %c2 = arith.constant 2 : index
    %2 = memref.load %arg1[%c2] : memref<3xf32, #tpu.memory_space<smem>>
    %c0_0 = arith.constant 0 : index
    %c0_1 = arith.constant 0 : index
    %3 = vector.load %arg2[%c0_0, %c0_1] : memref<16x128xf32, #tpu.memory_space<vmem>>, vector<16x128xf32>
    %4 = arith.mulf %3, %3 : vector<16x128xf32>
    %5 = arith.mulf %4, %3 : vector<16x128xf32>
    %6 = arith.subf %3, %5 : vector<16x128xf32>
    %7 = math.absf %6 : vector<16x128xf32>
    %8 = vector.broadcast %0 : f32 to vector<16x128xf32>
    %9 = arith.mulf %8, %7 : vector<16x128xf32>
    %10 = arith.addf %3, %5 : vector<16x128xf32>
    %11 = math.absf %10 : vector<16x128xf32>
    %12 = vector.broadcast %1 : f32 to vector<16x128xf32>
    %13 = arith.mulf %12, %11 : vector<16x128xf32>
    %14 = arith.addf %9, %13 : vector<16x128xf32>
    %cst = arith.constant dense<0x7F800000> : vector<16xf32>
    %15 = vector.multi_reduction <minimumf>, %14, %cst [1] : vector<16x128xf32> to vector<16xf32>
    %16 = vector.shape_cast %15 : vector<16xf32> to vector<16x1xf32>
    %cst_2 = arith.constant dense<0x7F800000> : vector<1xf32>
    %17 = vector.multi_reduction <minimumf>, %16, %cst_2 [0] : vector<16x1xf32> to vector<1xf32>
    %18 = vector.shape_cast %17 : vector<1xf32> to vector<1x1xf32>
    %cst_3 = arith.constant dense<0xFF800000> : vector<16xf32>
    %19 = vector.multi_reduction <maximumf>, %14, %cst_3 [1] : vector<16x128xf32> to vector<16xf32>
    %20 = vector.shape_cast %19 : vector<16xf32> to vector<16x1xf32>
    %cst_4 = arith.constant dense<0xFF800000> : vector<1xf32>
    %21 = vector.multi_reduction <maximumf>, %20, %cst_4 [0] : vector<16x1xf32> to vector<1xf32>
    %22 = vector.shape_cast %21 : vector<1xf32> to vector<1x1xf32>
    %23 = arith.subf %18, %22 : vector<1x1xf32>
    %24 = math.exp %23 : vector<1x1xf32>
    %cst_5 = arith.constant 1.000000e+00 : f32
    %25 = vector.broadcast %cst_5 : f32 to vector<1x1xf32>
    %26 = arith.subf %25, %24 : vector<1x1xf32>
    %27 = vector.broadcast %2 : f32 to vector<1x1xf32>
    %28 = arith.divf %27, %26 : vector<1x1xf32>
    %29 = vector.broadcast %22 : vector<1x1xf32> to vector<16x128xf32>
    %30 = arith.subf %14, %29 : vector<16x128xf32>
    %31 = math.exp %30 : vector<16x128xf32>
    %32 = vector.broadcast %24 : vector<1x1xf32> to vector<16x128xf32>
    %33 = arith.subf %31, %32 : vector<16x128xf32>
    %34 = vector.broadcast %28 : vector<1x1xf32> to vector<16x128xf32>
    %35 = arith.mulf %33, %34 : vector<16x128xf32>
    %36 = math.tanh %3 : vector<16x128xf32>
    %37 = arith.mulf %35, %36 : vector<16x128xf32>
    %c0_6 = arith.constant 0 : index
    %c0_7 = arith.constant 0 : index
    %38 = vector.load %arg3[%c0_6, %c0_7] : memref<16x128xf32, #tpu.memory_space<vmem>>, vector<16x128xf32>
    tpu.vector_store %arg3[%c0_6, %c0_7], %37 {strides = array<i32>} : memref<16x128xf32, #tpu.memory_space<vmem>>, vector<16x128xf32>,
    return
  }
  func.func @transform_0(%arg0: i32) -> i32 {
    %c0_i32 = arith.constant 0 : i32
    %c0_i32_0 = arith.constant 0 : i32
    return %c0_i32 : i32
  }
  func.func @transform_1(%arg0: i32) -> (i32, i32) {
    %c0_i32 = arith.constant 0 : i32
    %c0_i32_0 = arith.constant 0 : i32
    %c0_i32_1 = arith.constant 0 : i32
    return %c0_i32, %c0_i32_0 : i32, i32
  }
  func.func @transform_2(%arg0: i32) -> (i32, i32) {
    %c0_i32 = arith.constant 0 : i32
    %c0_i32_0 = arith.constant 0 : i32
    %c0_i32_1 = arith.constant 0 : i32
    return %c0_i32, %c0_i32_0 : i32, i32
  }
}

</mosaic_0001>

<bundles_post_ra>
// kernel: tpu_custom_call.1
= control target key start
LH: loop header
LB: loop body
LE: loop exit
PB: predicated region body
PF: predicated region fallthrough
CT: control target
= control target key end

     0   :  { %7 = vsyncpa [#allocation5], 0  ;;  %s266_s0 = inlined_call_operand.hbm [shape: f32[3], index: 0, kind: input, shape index: {}]   ;;  %s267_s1 = inlined_call_operand.hbm [shape: f32[16,128], index: 1, kind: input, shape index: {}]   ;;  %s268_s2 = inlined_call_operand.hbm [shape: f32[16,128], index: 2, kind: output, shape index: {}]  }
   0x1   :  { %8 = vsyncpa [#allocation3], 0 }
   0x2   :  { %9 = vsyncpa [#allocation4], 0  ;;  %s144_s11 = scalar_lea.hbm %s266_s0, 16 }
   0x3   :  { %p145_p0 = scmp.ne.s32.totalorder %s266_s0, %s144_s11  ;;  %p148_p1 = scmp.lt.u32.totalorder %s144_s11, %s266_s0 }
   0x5   :  { %p150_p2 = pnand %p148_p1, %p145_p0 }
   0x7   :  { %153 = shalt.err (!%p150_p2)
}
   0x8   :  { %s204_s16 = smov [#allocation2]   ;;  %s205_s19 = smov [#allocation6]  }
   0x9   :  { %17 = dma.hbm_to_smem %s266_s0, 16, %s204_s16, [#allocation5]  }
   0xa   :  { %s23_s20 = sshll.u32 %s205_s19, 4  ;;  %s154_s23 = scalar_lea.hbm %s267_s1, 256  ;;  %s24_s20 = int_to_ptr.vmem [resolvable:$true] %s23_s20 }
   0xb   :  { %p155_p3 = scmp.ne.s32.totalorder %s267_s1, %s154_s23  ;;  %p158_p4 = scmp.lt.u32.totalorder %s154_s23, %s267_s1 }
   0xd   :  { %p160_p5 = pnand %p158_p4, %p155_p3 }
   0xf   :  { %163 = shalt.err (!%p160_p5)
}
  0x10   :  { %s164_s28 = scalar_lea.vmem %s24_s20, 256  ;;  %p169_p7 = scmp.lt.s32.totalorder %s24_s20, %s24_s20 }
  0x11   :  { %p165_p6 = scmp.ne.s32.totalorder %s24_s20, %s164_s28  ;;  %p170_p8 = scmp.lt.s32.totalorder %s164_s28, %s164_s28 }
  0x13   :  { %p171_p9 = por %p170_p8, %p169_p7 }
  0x15   :  { %p172_p10 = pnand %p171_p9, %p165_p6 }
  0x17   :  { %175 = shalt.err (!%p172_p10)
}
  0x18   :  { %s206_s0 = smov 128   ;;  %s207_s29 = smov 8  }
  0x19   :  { %29 = dma.hbm_to_vmem [thread:$0]  %s267_s1, 256, %s24_s20, [#allocation3], %s206_s0, %s206_s0, %s207_s29  }
  0x1a   :  { %198 = dma.done.wait [#allocation5], 16  }
  0x1b   :  { %199 = vsyncadd [#allocation5], 4294967280 }
  0x1c   :  { %200 = dma.done.wait [#allocation3], 256  }
  0x1d   :  { %201 = vsyncadd [#allocation3], 4294967040 }
  0x1e   :  { %36 = sfence }
  0x1f   :  { %s37_s4 = sld [smem:[#allocation2]]  ;;  %s125_s5 = sld [smem:[#allocation2 + $0x1]]  ;;  %v40_v0 = vld [vmem:[#allocation6] sm:$0xff]  ;;  %v41_v1 = vld [vmem:[#allocation6 + $0x8] sm:$0xff] }
  0x20   :  { %v42_v2 = vmul.f32 %v40_v0, %v40_v0  ;;  %v43_v3 = vmul.f32 %v41_v1, %v41_v1  ;;  %s126_s1 = sld [smem:[#allocation2 + $0x2]]  ;;  %s208_s6 = smov [#allocation7]  }
  0x21   :  { %s112_s7 = sshll.u32 %s208_s6, 4  ;;  %s113_s7 = int_to_ptr.vmem [resolvable:$true] %s112_s7 }
  0x22   :  { %v44_v4 = vmul.f32 %v42_v2, %v40_v0  ;;  %v45_v5 = vmul.f32 %v43_v3, %v41_v1  ;;  %s176_s8 = scalar_lea.vmem %s113_s7, 256  ;;  %p181_p12 = scmp.lt.s32.totalorder %s113_s7, %s113_s7 }
  0x23   :  { %p177_p11 = scmp.ne.s32.totalorder %s113_s7, %s176_s8  ;;  %p182_p13 = scmp.lt.s32.totalorder %s176_s8, %s176_s8 }
  0x24   :  { %v46_v6 = vsub.f32 %v40_v0, %v44_v4  ;;  %v53_v7 = vadd.f32 %v44_v4, %v40_v0  ;;  %v47_v8 = vsub.f32 %v41_v1, %v45_v5  ;;  %v54_v9 = vadd.f32 %v45_v5, %v41_v1 }
  0x25   :  { %v50_v10 = vstv %s37_s4  ;;  %v57_v11 = vstv %s125_s5  ;;  %p183_p0 = por %p182_p13, %p181_p12 }
  0x26   :  { %v48_v12 = vand.u32 2147483647, %v46_v6  ;;  %v55_v13 = vand.u32 2147483647, %v53_v7  ;;  %v49_v14 = vand.u32 2147483647, %v47_v8  ;;  %v88_v50 = vstv %s126_s1 }
  0x27   :  { %v56_v15 = vand.u32 2147483647, %v54_v9  ;;  %p184_p1 = pnand %p183_p0, %p177_p11 }
  0x28   :  { %v51_v16 = vmul.f32 %v50_v10, %v48_v12  ;;  %v58_v17 = vmul.f32 %v57_v11, %v55_v13  ;;  %v52_v18 = vmul.f32 %v50_v10, %v49_v14 }
  0x29   :  { %v59_v19 = vmul.f32 %v57_v11, %v56_v15 }
  0x2a   :  { %v60_v20 = vadd.f32 %v58_v17, %v51_v16 }
  0x2b   :  { %v61_v21 = vadd.f32 %v59_v19, %v52_v18 }
  0x2c   :  { %73 = vmax.xlane.f32.xlu1 %v60_v20  ;;  %62 = vmin.xlane.f32.xlu0 %v60_v20 }
  0x30   :  { %75 = vmax.xlane.f32.xlu1 %v61_v21  ;;  %64 = vmin.xlane.f32.xlu0 %v61_v21 }
  0xb9   :  { %v74_v22 = vpop.xlane.xlu1 %73  ;;  %v63_v23 = vpop.xlane.xlu0 %62 }
  0xbd   :  { %v76_v24 = vpop.xlane.xlu1 %75  ;;  %v65_v25 = vpop.xlane.xlu0 %64 }
  0xbe   :  { %v77_v26 = vmax.f32 %v74_v22, %v76_v24  ;;  %v66_v27 = vmin.f32 %v63_v23, %v65_v25 }
  0xc0   :  { %v78_v28 = vrot.slane %v77_v26, 4  ;;  %v67_v29 = vrot.slane %v66_v27, 4 }
  0xc2   :  { %v79_v30 = vmax.f32 %v77_v26, %v78_v28  ;;  %v68_v31 = vmin.f32 %v66_v27, %v67_v29 }
  0xc4   :  { %v80_v32 = vrot.slane %v79_v30, 2  ;;  %v69_v33 = vrot.slane %v68_v31, 2 }
  0xc6   :  { %v81_v34 = vmax.f32 %v79_v30, %v80_v32  ;;  %v70_v35 = vmin.f32 %v68_v31, %v69_v33 }
  0xc8   :  { %v82_v36 = vrot.slane %v81_v34, 1  ;;  %v71_v37 = vrot.slane %v70_v35, 1 }
  0xca   :  { %v83_v38 = vmax.f32 %v81_v34, %v82_v36  ;;  %v72_v39 = vmin.f32 %v70_v35, %v71_v37 }
  0xcc   :  { %v84_v40 = vsub.f32 %v72_v39, %v83_v38  ;;  %v91_v42 = vsub.f32 %v60_v20, %v83_v38  ;;  %v92_v43 = vsub.f32 %v61_v21, %v83_v38 }
  0xce   :  { %v85_v41 = vmul.f32 1.442695, %v84_v40  ;;  %v93_v44 = vmul.f32 1.442695, %v91_v42  ;;  %v95_v45 = vmul.f32 1.442695, %v92_v43 }
  0xd0   :  { %132 = vpow2.f32 %v85_v41 }
  0xd1   :  { %134 = vpow2.f32 %v93_v44 }
  0xd2   :  { %136 = vpow2.f32 %v95_v45 }
  0xda   :  { %v133_v46 = vpop.eup %132 }
  0xdb   :  { %v87_v47 = vsub.f32 1.0, %v133_v46  ;;  %v135_v48 = vpop.eup %134 }
  0xdc   :  { %v137_v49 = vpop.eup %136  ;;  %v97_v54 = vsub.f32 %v135_v48, %v133_v46 }
  0xdd   :  { %138 = vrcp.f32 %v87_v47  ;;  %v98_v55 = vsub.f32 %v137_v49, %v133_v46 }
  0xde   :  { %140 = vtanh.f32 %v40_v0 }
  0xdf   :  { %142 = vtanh.f32 %v41_v1 }
  0xe7   :  { %v139_v51 = vpop.eup %138 }
  0xe8   :  { %v141_v52 = vpop.eup %140  ;;  %v90_v53 = vmul.f32 %v139_v51, %v88_v50 }
  0xe9   :  { %v143_v56 = vpop.eup %142 }
  0xea   :  { %v99_v57 = vmul.f32 %v97_v54, %v90_v53  ;;  %v100_v58 = vmul.f32 %v98_v55, %v90_v53 }
  0xec   :  { %v103_v59 = vmul.f32 %v141_v52, %v99_v57  ;;  %v104_v60 = vmul.f32 %v143_v56, %v100_v58 }
  0xee   :  { %105 = vst [vmem:[#allocation7] sm:$0xff] %v103_v59  ;;  %106 = vst [vmem:[#allocation7 + $0x8] sm:$0xff] %v104_v60 }
  0xef   :  { %187 = shalt.err (!%p184_p1)
}
  0xf0   :  { %s188_s11 = scalar_lea.hbm %s268_s2, 256 }
  0xf1   :  { %p189_p2 = scmp.ne.s32.totalorder %s268_s2, %s188_s11  ;;  %p192_p3 = scmp.lt.u32.totalorder %s188_s11, %s268_s2 }
  0xf3   :  { %p194_p4 = pnand %p192_p3, %p189_p2 }
  0xf5   :  { %197 = shalt.err (!%p194_p4)
}
  0xf6   :  { %118 = dma.vmem_to_hbm [thread:$0]  %s113_s7, 256, %s268_s2, [#allocation4], %s206_s0, %s206_s0, %s207_s29  }
  0xf7   :  { %202 = dma.done.wait [#allocation4], 256  }
  0xf8   :  { %203 = vsyncadd [#allocation4], 4294967040 }
  0xf9   :  { %122 = vsyncpa [#allocation3], 1 }
  0xfa   :  { %123 = vsyncpa [#allocation4], 1 }
  0xfb   :  { %124 = vsyncpa [#allocation5], 1 }

</bundles_post_ra>
